<compile_context>
chip_gen: v6e
topology: v6e:2x2x1
jax: 0.10.0
libtpu: 0.0.40
codegen_flags: <defaults>
</compile_context>

<pallas_src>
import math

import jax
import jax.numpy as jnp
from jax.experimental import pallas as pl
from jax.experimental.pallas import tpu as pltpu


def _lcm(a, b):
    return a * b // math.gcd(a, b)


def _hw_info():
    """(vmem_capacity_bytes, has_two_tensorcores_per_chip) with safe fallbacks."""
    vmem = 128 * 1024 * 1024
    two_tc = False
    try:
        info = pltpu.get_tpu_info()
        v = getattr(info, "vmem_capacity_bytes", None)
        if v:
            vmem = int(v)
    except Exception:
        pass
    try:
        kind = jax.devices()[0].device_kind.lower()
        # 2 TensorCores per chip: v4 / v5p megacore, v7x dual-TC.
        two_tc = ("v4" in kind) or ("v5p" in kind) or ("7" in kind)
        if "7" in kind:
            vmem = min(vmem, 64 * 1024 * 1024)
    except Exception:
        pass
    return vmem, two_tc


def _choose_tiling(B, C, HW, channel, itemsize, budget, two_tc):
    """Returns (mode, b_tile, c_tile, hw_tile)."""
    sub_gran = 8 if itemsize >= 4 else (16 if itemsize == 2 else 32)
    per_example = C * HW * itemsize

    # --- preferred: whole (C, HW) slab per example fits -> batch examples.
    if per_example <= budget:
        b_tile = max(1, min(B, budget // per_example))
        if two_tc and B >= 2:
            # keep >= 2 steps on the parallel batch axis so both TCs get work;
            # on single-TC chips (v5e/v6e) we keep the biggest contiguous block.
            b_tile = min(b_tile, max(1, B // 2))
        while B % b_tile:
            b_tile -= 1
        return "C", b_tile, C, HW

    # --- tile the channel (sublane) axis; blocks stay fully contiguous in HBM.
    granule = _lcm(channel, sub_gran)
    if C % granule == 0:
        best = 0
        d = granule
        while d < C:
            if C % d == 0 and d * HW * itemsize <= budget:
                best = d
            d += granule
        if best:
            return "C", 1, best, HW

    # --- last resort: tile the spatial (lane) axis in 128-lane multiples.
    hw_tile = max(128, (budget // (C * itemsize)) // 128 * 128)
    hw_tile = min(hw_tile, max(128, (HW // 128) * 128))
    return "HW", 1, C, hw_tile


def _epilogue_math(spatial_sums, w, bias, num_groups, channel, inv_hw):
    """spatial_sums: (b_tile, G*channel) f32 per-channel spatial sums."""
    b_tile = spatial_sums.shape[0]
    # Stage groups on sublanes, channel on lanes: the L2-norm and the Linear
    # become plain lane reductions (no per-group sub-vreg slicing/concat).
    p = spatial_sums.reshape(b_tile * num_groups, channel) * inv_hw   # means
    l2 = jnp.sqrt(jnp.sum(p * p, axis=-1, keepdims=True))
    normed = p / jnp.maximum(l2, 1e-12)                # F.normalize eps=1e-12
    logits = jnp.sum((1.0 - normed) * w, axis=-1, keepdims=True)   # (b*G, 1)
    logits = logits.reshape(b_tile, num_groups) + bias              # + fc bias
    m = jnp.max(logits, axis=-1, keepdims=True)                     # stable softmax
    e = jnp.exp(logits - m)
    return e / jnp.sum(e, axis=-1, keepdims=True)


# --------------------------------------------------------------------------
# Mode "C": blocks (b_tile, c_tile, HW) -- fully contiguous HBM slabs, the
# grid's second axis walks channel tiles (no spatial reduction loop at all).
# --------------------------------------------------------------------------
def _make_kernel_c(num_groups, channel, c_steps, inv_hw):
    def kernel(x_ref, w_ref, b_ref, o_ref, acc_ref):
        c = pl.program_id(1)
        # Per-channel spatial sums of one contiguous slab; the lane reduce
        # happens once per c step and is amortized over the full HW extent.
        sums = jnp.sum(x_ref[...].astype(jnp.float32), axis=-1)  # (b_tile, c_tile)
        if c_steps > 1:
            acc_ref[c] = sums

        @pl.when(c == c_steps - 1)
        def _epilogue():
            if c_steps == 1:
                pooled = sums
            else:
                pooled = jnp.concatenate(
                    [acc_ref[i] for i in range(c_steps)], axis=-1)  # (b_tile, C)
            out = _epilogue_math(pooled, w_ref[...], b_ref[...],
                                 num_groups, channel, inv_hw)
            o_ref[...] = out.astype(o_ref.dtype)

    return kernel


# --------------------------------------------------------------------------
# Mode "HW": fallback spatial tiling.  Lane-folded (1, C, 128) f32 accumulator
# updated with pure vld + VPU adds; ragged tail masked in-kernel (no jnp.pad).
# --------------------------------------------------------------------------
def _fold_lanes_f32(x_ref, acc, valid=None):
    """acc + 128-lane-folded f32 sum of a (1, C, L) block (L % 128 == 0).

    Pure vld + VPU convert/add per 128-lane slice: no cross-lane (XLU) reduce
    and no large f32 intermediate in the hot loop.  `valid` (static int)
    zero-masks lanes >= valid (the undefined tail of a partial edge block).
    """
    n_blocks = x_ref.shape[-1] // 128

    def body(i, a):
        off = pl.multiple_of(i * 128, 128)
        xs = x_ref[:, :, pl.ds(off, 128)].astype(jnp.float32)
        if valid is not None:
            lane = jax.lax.broadcasted_iota(jnp.int32, xs.shape, 2) + off
            xs = jnp.where(lane < valid, xs, 0.0)
        return a + xs

    return jax.lax.fori_loop(0, n_blocks, body, acc, unroll=min(n_blocks, 8))


def _make_kernel_hw(num_groups, channel, HW, hw_tile, k_steps, inv_hw):
    tail = HW - (k_steps - 1) * hw_tile      # valid lanes in the last block
    ragged = tail != hw_tile

    def kernel(x_ref, w_ref, b_ref, o_ref, acc_ref):
        k = pl.program_id(1)

        @pl.when(k == 0)
        def _init():
            acc_ref[...] = jnp.zeros_like(acc_ref)

        if ragged:
            @pl.when(k != k_steps - 1)
            def _full():
                acc_ref[...] = _fold_lanes_f32(x_ref, acc_ref[...])

            @pl.when(k == k_steps - 1)
            def _masked():
                # The edge block reads past HW (undefined data) -> mask it off.
                acc_ref[...] = _fold_lanes_f32(x_ref, acc_ref[...], valid=tail)
        else:
            acc_ref[...] = _fold_lanes_f32(x_ref, acc_ref[...])

        @pl.when(k == k_steps - 1)
        def _epilogue():
            sums = jnp.sum(acc_ref[...], axis=-1)       # (1, C): XLU once
            out = _epilogue_math(sums, w_ref[...], b_ref[...],
                                 num_groups, channel, inv_hw)
            o_ref[...] = out.astype(o_ref.dtype)

    return kernel


def priority_network_forward(x_nchw, fc_w, fc_b, *, num_cam, tau_1, channel,
                             block_budget_bytes=None):
    """Forward pass of LightweightPriorityNetwork.  x_nchw: (B, C, H, W)."""
    B, C, H, W = x_nchw.shape
    G = num_cam * (tau_1 + 1)
    assert C == G * channel, "C must equal num_cam*(tau_1+1)*channel"
    HW = H * W

    # Dense (B, C, H*W) view, native dtype (bf16 stays bf16), NO host padding.
    x3 = x_nchw.reshape(B, C, HW)
    itemsize = x3.dtype.itemsize

    vmem_bytes, two_tc = _hw_info()
    if block_budget_bytes is None:
        # 2x (double-buffered) budget must stay well inside scoped VMEM:
        # 16 MiB blocks on 128 MiB parts (v5e/v6e), 12 MiB on v7x (64 MiB).
        block_budget_bytes = (12 if vmem_bytes <= 64 * 1024 * 1024 else 16) * 1024 * 1024

    mode, b_tile, c_tile, hw_tile = _choose_tiling(
        B, C, HW, channel, itemsize, block_budget_bytes, two_tc)

    w2 = fc_w.reshape(1, channel).astype(jnp.float32)
    b2 = fc_b.reshape(1, 1).astype(jnp.float32)
    inv_hw = 1.0 / float(HW)

    if mode == "C":
        c_steps = C // c_tile
        grid = (B // b_tile, c_steps)
        kernel = _make_kernel_c(G, channel, c_steps, inv_hw)
        in_specs = [
            pl.BlockSpec((b_tile, c_tile, HW), lambda b, c: (b, c, 0)),
            pl.BlockSpec((1, channel), lambda b, c: (0, 0)),
            pl.BlockSpec((1, 1), lambda b, c: (0, 0)),
        ]
        out_specs = pl.BlockSpec((b_tile, G), lambda b, c: (b, 0))
        scratch = [pltpu.VMEM((c_steps, b_tile, c_tile), jnp.float32)]
        x_block_bytes = b_tile * c_tile * HW * itemsize
        acc_bytes = c_steps * b_tile * c_tile * 4
    else:
        k_steps = -(-HW // hw_tile)
        grid = (B, k_steps)
        kernel = _make_kernel_hw(G, channel, HW, hw_tile, k_steps, inv_hw)
        in_specs = [
            pl.BlockSpec((1, C, hw_tile), lambda b, k: (b, 0, k)),
            pl.BlockSpec((1, channel), lambda b, k: (0, 0)),
            pl.BlockSpec((1, 1), lambda b, k: (0, 0)),
        ]
        out_specs = pl.BlockSpec((1, G), lambda b, k: (b, 0))
        scratch = [pltpu.VMEM((1, C, 128), jnp.float32)]
        x_block_bytes = C * hw_tile * itemsize
        acc_bytes = C * 128 * 4

    # Right-sized scoped VMEM: double-buffered x block + accumulator +
    # ~2 MiB headroom for out/w/b buffers and compiler temporaries.
    cap = max(vmem_bytes - 16 * 1024 * 1024, 32 * 1024 * 1024)
    vmem_limit = int(min(2 * x_block_bytes + acc_bytes + 2 * 1024 * 1024, cap))

    return pl.pallas_call(
        kernel,
        out_shape=jax.ShapeDtypeStruct((B, G), jnp.float32),
        grid=grid,
        in_specs=in_specs,
        out_specs=out_specs,
        scratch_shapes=scratch,
        compiler_params=pltpu.CompilerParams(
            dimension_semantics=("parallel", "arbitrary"),
            vmem_limit_bytes=vmem_limit),
    )(x3, w2, b2)


def _reference_forward(x_nchw, fc_w, fc_b, *, num_cam, tau_1, channel):
    """Pure-JAX reference mirroring the PyTorch module (f32 math)."""
    B, C, H, W = x_nchw.shape
    G = num_cam * (tau_1 + 1)
    xf = x_nchw.astype(jnp.float32)
    pooled = jnp.mean(xf, axis=(2, 3)).reshape(B, G, channel)
    l2 = jnp.sqrt(jnp.sum(pooled * pooled, axis=2, keepdims=True))
    normed = pooled / jnp.maximum(l2, 1e-12)
    logits = jnp.einsum("bgc,c->bg", 1.0 - normed, fc_w.astype(jnp.float32))
    logits = logits + fc_b.astype(jnp.float32)
    return jax.nn.softmax(logits, axis=1)


if __name__ == "__main__":
    key = jax.random.PRNGKey(0)
    k1, k2, k3, k4, k5, k6, k7, k8, k9 = jax.random.split(key, 9)

    # --- Test 1: f32, whole (C, HW) slab fits -> contiguous full blocks,
    #             batch axis parallel.  num_cam=2, tau_1=1, channel=4.
    num_cam, tau_1, channel = 2, 1, 4
    B, H, W = 2, 16, 16
    G = num_cam * (tau_1 + 1)
    C = G * channel
    x = jax.random.normal(k1, (B, C, H, W), dtype=jnp.float32)
    bound = 1.0 / float(channel) ** 0.5
    fc_w = jax.random.uniform(k2, (channel,), jnp.float32, -bound, bound)
    fc_b = jax.random.uniform(k3, (), jnp.float32, -bound, bound)

    out = jax.block_until_ready(priority_network_forward(
        x, fc_w, fc_b, num_cam=num_cam, tau_1=tau_1, channel=channel))
    ref = _reference_forward(x, fc_w, fc_b, num_cam=num_cam, tau_1=tau_1,
                             channel=channel)
    assert out.shape == (B, G)
    assert jnp.allclose(out, ref, atol=1e-5, rtol=1e-5), (out, ref)

    # --- Test 2: bf16 input, forced-tiny budget -> channel-axis tiling
    #             (c_tile=16 of C=48, full contiguous HW=576 per block).
    num_cam2, tau_12, channel2 = 3, 1, 8
    B2, H2, W2 = 2, 24, 24
    G2 = num_cam2 * (tau_12 + 1)
    C2 = G2 * channel2
    x2 = jax.random.normal(k4, (B2, C2, H2, W2), jnp.float32).astype(jnp.bfloat16)
    bound2 = 1.0 / float(channel2) ** 0.5
    fc_w2 = jax.random.uniform(k5, (channel2,), jnp.float32, -bound2, bound2)
    fc_b2 = jax.random.uniform(k6, (), jnp.float32, -bound2, bound2)

    out2 = jax.block_until_ready(priority_network_forward(
        x2, fc_w2, fc_b2, num_cam=num_cam2, tau_1=tau_12, channel=channel2,
        block_budget_bytes=20 * 1024))            # forces the C-tiled path
    ref2 = _reference_forward(x2, fc_w2, fc_b2, num_cam=num_cam2,
                              tau_1=tau_12, channel=channel2)
    assert out2.shape == (B2, G2)
    assert jnp.allclose(out2, ref2, atol=1e-5, rtol=1e-5), (out2, ref2)

    # --- Test 3: f32, budget so small that even one channel-granule row of
    #             the full HW doesn't fit -> HW-tiled fallback with in-kernel
    #             masked ragged tail (HW=400, hw_tile=128, 4 steps, no pad).
    num_cam3, tau_13, channel3 = 2, 0, 8
    B3, H3, W3 = 2, 20, 20
    G3 = num_cam3 * (tau_13 + 1)
    C3 = G3 * channel3
    x3_in = jax.random.normal(k7, (B3, C3, H3, W3), dtype=jnp.float32)
    bound3 = 1.0 / float(channel3) ** 0.5
    fc_w3 = jax.random.uniform(k8, (channel3,), jnp.float32, -bound3, bound3)
    fc_b3 = jax.random.uniform(k9, (), jnp.float32, -bound3, bound3)

    out3 = jax.block_until_ready(priority_network_forward(
        x3_in, fc_w3, fc_b3, num_cam=num_cam3, tau_1=tau_13, channel=channel3,
        block_budget_bytes=9 * 1024))             # forces the HW-tiled path
    ref3 = _reference_forward(x3_in, fc_w3, fc_b3, num_cam=num_cam3,
                              tau_1=tau_13, channel=channel3)
    assert out3.shape == (B3, G3)
    assert jnp.allclose(out3, ref3, atol=1e-5, rtol=1e-5), (out3, ref3)

    print("KERNEL_OK")
</pallas_src>

<mosaic_0001>
module attributes {stable_mosaic.version = 11 : i64} {
  func.func @kernel(%arg0: i32, %arg1: i32, %arg2: memref<2x16x256xf32, #tpu.memory_space<vmem>>, %arg3: memref<1x4xf32, #tpu.memory_space<vmem>>, %arg4: memref<1x1xf32, #tpu.memory_space<vmem>>, %arg5: memref<2x4xf32, #tpu.memory_space<vmem>>, %arg6: memref<1x2x16xf32, #tpu.memory_space<vmem>>) attributes {dimension_semantics = [#tpu.dimension_semantics<parallel>, #tpu.dimension_semantics<arbitrary>], iteration_bounds = array<i64: 1, 1>, scalar_prefetch = 0 : i64, scratch_operands = 1 : i64, tpu.core_type = #tpu.core_type<tc>, window_params = [{transform_indices = @transform_0, window_bounds = array<i64: 2, 16, 256>}, {pipeline_mode = #tpu.pipeline_mode<synchronous>, transform_indices = @transform_1, window_bounds = array<i64: 1, 4>}, {pipeline_mode = #tpu.pipeline_mode<synchronous>, transform_indices = @transform_2, window_bounds = array<i64: 1, 1>}, {transform_indices = @transform_3, window_bounds = array<i64: 2, 4>}]} {
    %c0 = arith.constant 0 : index
    %c0_0 = arith.constant 0 : index
    %c0_1 = arith.constant 0 : index
    %0 = vector.load %arg2[%c0, %c0_0, %c0_1] : memref<2x16x256xf32, #tpu.memory_space<vmem>>, vector<2x16x256xf32>
    %cst = arith.constant dense<0.000000e+00> : vector<2x16xf32>
    %1 = vector.multi_reduction <add>, %0, %cst [2] : vector<2x16x256xf32> to vector<2x16xf32>
    %c0_i32 = arith.constant 0 : i32
    %2 = arith.cmpi eq, %arg1, %c0_i32 : i32
    %3 = arith.extui %2 : i1 to i32
    %c0_i32_2 = arith.constant 0 : i32
    %4 = arith.cmpi ne, %3, %c0_i32_2 : i32
    scf.if %4 {
      %c0_3 = arith.constant 0 : index
      %c0_4 = arith.constant 0 : index
      %5 = vector.load %arg3[%c0_3, %c0_4] : memref<1x4xf32, #tpu.memory_space<vmem>>, vector<1x4xf32>
      %c0_5 = arith.constant 0 : index
      %c0_6 = arith.constant 0 : index
      %6 = vector.load %arg4[%c0_5, %c0_6] : memref<1x1xf32, #tpu.memory_space<vmem>>, vector<1x1xf32>
      %7 = vector.shape_cast %1 : vector<2x16xf32> to vector<8x4xf32>
      %cst_7 = arith.constant 3.906250e-03 : f32
      %8 = vector.broadcast %cst_7 : f32 to vector<8x4xf32>
      %9 = arith.mulf %7, %8 : vector<8x4xf32>
      %10 = arith.mulf %9, %9 : vector<8x4xf32>
      %cst_8 = arith.constant dense<0.000000e+00> : vector<8xf32>
      %11 = vector.multi_reduction <add>, %10, %cst_8 [1] : vector<8x4xf32> to vector<8xf32>
      %12 = vector.shape_cast %11 : vector<8xf32> to vector<8x1xf32>
      %13 = math.sqrt %12 : vector<8x1xf32>
      %cst_9 = arith.constant 9.99999996E-13 : f32
      %14 = vector.broadcast %cst_9 : f32 to vector<8x1xf32>
      %15 = arith.maximumf %13, %14 : vector<8x1xf32>
      %16 = vector.broadcast %15 : vector<8x1xf32> to vector<8x4xf32>
      %17 = arith.divf %9, %16 : vector<8x4xf32>
      %cst_10 = arith.constant 1.000000e+00 : f32
      %18 = vector.broadcast %cst_10 : f32 to vector<8x4xf32>
      %19 = arith.subf %18, %17 : vector<8x4xf32>
      %20 = vector.broadcast %5 : vector<1x4xf32> to vector<8x4xf32>
      %21 = arith.mulf %19, %20 : vector<8x4xf32>
      %cst_11 = arith.constant dense<0.000000e+00> : vector<8xf32>
      %22 = vector.multi_reduction <add>, %21, %cst_11 [1] : vector<8x4xf32> to vector<8xf32>
      %23 = vector.shape_cast %22 : vector<8xf32> to vector<8x1xf32>
      %24 = vector.shape_cast %23 : vector<8x1xf32> to vector<2x4xf32>
      %25 = vector.broadcast %6 : vector<1x1xf32> to vector<2x4xf32>
      %26 = arith.addf %24, %25 : vector<2x4xf32>
      %cst_12 = arith.constant dense<0xFF800000> : vector<2xf32>
      %27 = vector.multi_reduction <maximumf>, %26, %cst_12 [1] : vector<2x4xf32> to vector<2xf32>
      %28 = vector.shape_cast %27 : vector<2xf32> to vector<2x1xf32>
      %29 = vector.broadcast %28 : vector<2x1xf32> to vector<2x4xf32>
      %30 = arith.subf %26, %29 : vector<2x4xf32>
      %31 = math.exp %30 : vector<2x4xf32>
      %cst_13 = arith.constant dense<0.000000e+00> : vector<2xf32>
      %32 = vector.multi_reduction <add>, %31, %cst_13 [1] : vector<2x4xf32> to vector<2xf32>
      %33 = vector.shape_cast %32 : vector<2xf32> to vector<2x1xf32>
      %34 = vector.broadcast %33 : vector<2x1xf32> to vector<2x4xf32>
      %35 = arith.divf %31, %34 : vector<2x4xf32>
      %c0_14 = arith.constant 0 : index
      %c0_15 = arith.constant 0 : index
      %36 = vector.load %arg5[%c0_14, %c0_15] : memref<2x4xf32, #tpu.memory_space<vmem>>, vector<2x4xf32>
      tpu.vector_store %arg5[%c0_14, %c0_15], %35 {strides = array<i32>} : memref<2x4xf32, #tpu.memory_space<vmem>>, vector<2x4xf32>,
    } else {
    }
    return
  }
  func.func @transform_0(%arg0: i32, %arg1: i32) -> (i32, i32, i32) {
    %c0_i32 = arith.constant 0 : i32
    %c0_i32_0 = arith.constant 0 : i32
    return %arg0, %arg1, %c0_i32 : i32, i32, i32
  }
  func.func @transform_1(%arg0: i32, %arg1: i32) -> (i32, i32) {
    %c0_i32 = arith.constant 0 : i32
    %c0_i32_0 = arith.constant 0 : i32
    %c0_i32_1 = arith.constant 0 : i32
    return %c0_i32, %c0_i32_0 : i32, i32
  }
  func.func @transform_2(%arg0: i32, %arg1: i32) -> (i32, i32) {
    %c0_i32 = arith.constant 0 : i32
    %c0_i32_0 = arith.constant 0 : i32
    %c0_i32_1 = arith.constant 0 : i32
    return %c0_i32, %c0_i32_0 : i32, i32
  }
  func.func @transform_3(%arg0: i32, %arg1: i32) -> (i32, i32) {
    %c0_i32 = arith.constant 0 : i32
    %c0_i32_0 = arith.constant 0 : i32
    return %arg0, %c0_i32 : i32, i32
  }
}

</mosaic_0001>

<bundles_post_ra>
// kernel: tpu_custom_call.1
= control target key start
LH: loop header
LB: loop body
LE: loop exit
PB: predicated region body
PF: predicated region fallthrough
CT: control target
= control target key end

     0   :  { %s904_s0 = inlined_call_operand.hbm [shape: f32[2,16,256], index: 0, kind: input, shape index: {}]   ;;  %s905_s1 = inlined_call_operand.vmem [shape: f32[1,4], index: 1, kind: input, shape index: {}]   ;;  %s906_s2 = inlined_call_operand.<no memory space> [shape: f32[1,1], index: 2, kind: input, shape index: {}]   ;;  %s907_s3 = inlined_call_operand.hbm [shape: f32[2,4], index: 3, kind: output, shape index: {}]  }
   0x1   :  { %v8_v0 = vstv %s906_s2 }
   0x2   :  { %9 = vst [vmem:[#allocation3] sm:$0x1] %v8_v0 }
   0x3   :  { %10 = vsyncpa [#allocation5], 0 }
   0x4   :  { %11 = vsyncpa [#allocation6], 0  ;;  %s736_s14 = smov [#allocation4]  }
   0x5   :  { %s17_s15 = sshll.u32 %s736_s14, 4  ;;  %s18_s15 = int_to_ptr.vmem [resolvable:$true] %s17_s15 }
   0x6   :  { %s700_s16 = scalar_lea.vmem %s18_s15, 1024  ;;  %p705_p1 = scmp.lt.s32.totalorder %s18_s15, %s18_s15 }
   0x7   :  { %p701_p0 = scmp.ne.s32.totalorder %s18_s15, %s700_s16  ;;  %p706_p2 = scmp.lt.s32.totalorder %s700_s16, %s700_s16 }
   0x9   :  { %p707_p3 = por %p706_p2, %p705_p1 }
   0xb   :  { %p708_p4 = pnand %p707_p3, %p701_p0 }
   0xd   :  { %711 = shalt.err (!%p708_p4)
}
   0xe   :  { %s737_s17 = smov 256   ;;  %s738_s18 = smov 16  }
   0xf   :  { %23 = dma.hbm_to_vmem [thread:$0]  %s904_s0, 1024, %s18_s15, [#allocation5], %s737_s17, %s737_s17, %s738_s18  }
  0x10   :  { %732 = dma.done.wait [#allocation5], 1024  }
  0x11   :  { %733 = vsyncadd [#allocation5], 4294966272  ;;  %v31_v1 = vld [vmem:[#allocation4] sm:$0xff]  ;;  %v32_v2 = vld [vmem:[#allocation4 + $0x8] sm:$0xff]  ;;  %v739_v13 = vmov 0   ;;  %v64_v16 = vlaneseq  ;;  %vm207_vm0 = vcmask 1041409  }
  0x12   :  { %v33_v3 = vld [vmem:[#allocation4 + $0x10] sm:$0xff]  ;;  %v39_v4 = vadd.f32 %v32_v2, %v31_v1  ;;  %v34_v5 = vld [vmem:[#allocation4 + $0x18] sm:$0xff]  ;;  %v35_v6 = vld [vmem:[#allocation4 + $0x20] sm:$0xff]  ;;  %665 = vset.pattern.permute.xlu1 %v739_v13  ;;  %664 = vset.pattern.permute.xlu0 %v739_v13  ;;  %v740_v14 = vmov 839922192   ;;  %vm209_vm1 = vcmask 1042434  }
  0x13   :  { %v36_v7 = vld [vmem:[#allocation4 + $0x28] sm:$0xff]  ;;  %v37_v9 = vld [vmem:[#allocation4 + $0x30] sm:$0xff]  ;;  %v38_v10 = vld [vmem:[#allocation4 + $0x38] sm:$0xff]  ;;  %v42_v11 = vadd.f32 %v34_v5, %v33_v3  ;;  %v62_v15 = vunpack.c.l.s4 %v740_v14  ;;  %v741_v17 = vmov 1985246804   ;;  %v769_v20 = vshrl.u32 %v64_v16, 7 }
  0x14   :  { %v45_v8 = vadd.f32 %v36_v7, %v35_v6  ;;  %40 = vadd.xlane.f32.xlu0 %v39_v4  ;;  %v48_v12 = vadd.f32 %v38_v10, %v37_v9  ;;  %v69_v18 = vunpack.c.l.s4 %v741_v17  ;;  %v174_v55 = vand.u32 127, %v64_v16  ;;  %v655_v14 = vld [vmem:[%s905_s1] ss:$0 sm:$0xff]  ;;  %s742_s1 = smov [#allocation7]  }
  0x15   :  { %v63_v19 = vunpack.c.0.s8 %v62_v15  ;;  %vm211_vm2 = vcmask 1043459   ;;  %vm213_vm3 = vcmask 1044484   ;;  %vm215_vm4 = vcmask 1045509   ;;  %s646_s21 = sshll.u32 %s742_s1, 4  ;;  %s647_s21 = int_to_ptr.vmem [resolvable:$true] %s646_s21 }
  0x16   :  { %46 = vadd.xlane.f32.xlu1 %v45_v8  ;;  %v70_v21 = vunpack.c.0.s8 %v69_v18  ;;  %v818_v57 = vsub.s32 %v174_v55, %v769_v20  ;;  %vm217_vm5 = vcmask 1046534   ;;  %vm219_vm6 = vcmask 1047559   ;;  %s712_s22 = scalar_lea.vmem %s647_s21, 32  ;;  %p717_p6 = scmp.lt.s32.totalorder %s647_s21, %s647_s21 }
  0x17   :  { %v772_v22 = vsub.s32 %v63_v19, %v769_v20  ;;  %vm222_vm7 = vcmask 31744   ;;  %v343_v15 = vcombine.high %v655_v14, %v655_v14  ;;  %v840_v16 = vsub.s32 0, %v769_v20  ;;  %p713_p5 = scmp.ne.s32.totalorder %s647_s21, %s712_s22  ;;  %p718_p7 = scmp.lt.s32.totalorder %s712_s22, %s712_s22 }
  0x18   :  { %43 = vadd.xlane.f32.xlu0 %v42_v11  ;;  %v775_v23 = vsub.s32 %v70_v21, %v769_v20  ;;  %v844_v19 = vsub.s32 1, %v769_v20  ;;  %v301_v55 = vsub.s32 7, %v769_v20  ;;  %vm538_vm10 = vcmask 25600  }
  0x19   :  { %v344_v17 = vcombine.low %v655_v14, %v343_v15  ;;  %p719_p8 = por %p718_p7, %p717_p6 }
  0x1a   :  { %49 = vadd.xlane.f32.xlu1 %v48_v12 }
  0x1b   :  { %v348_v18 = vrot.slane %v344_v17, %v840_v16  ;;  %v355_v21 = vrot.slane %v344_v17, %v844_v19  ;;  %p720_p9 = pnand %p719_p8, %p713_p5 }
  0x9d   :  { %v41_v24 = vpop.xlane.xlu0 %40 }
  0x9e   :  { %v67_v25 = vrot.slane %v41_v24, %v772_v22  ;;  %v74_v26 = vrot.slane %v41_v24, %v775_v23  ;;  %v294_v24 = vsub.s32 6, %v769_v20 }
  0x9f   :  { %v47_v30 = vpop.xlane.xlu1 %46 }
  0xa0   :  { %v779_v27 = vmul.f32 0.00390625, %v67_v25  ;;  %v781_v28 = vmul.f32 0.00390625, %v74_v26  ;;  %v95_v36 = vrot.slane %v47_v30, %v772_v22  ;;  %v102_v41 = vrot.slane %v47_v30, %v775_v23 }
  0xa1   :  { %v44_v29 = vpop.xlane.xlu0 %43  ;;  %v390_v25 = vrot.slane %v344_v17, %v294_v24 }
  0xa2   :  { %v81_v31 = vrot.slane %v44_v29, %v772_v22  ;;  %v88_v32 = vrot.slane %v44_v29, %v775_v23  ;;  %v134_v33 = vmul.f32 %v781_v28, %v781_v28  ;;  %v133_v34 = vmul.f32 %v779_v27, %v779_v27 }
  0xa3   :  { %v796_v39 = vmul.f32 0.00390625, %v95_v36  ;;  %v50_v40 = vpop.xlane.xlu1 %49  ;;  %v804_v45 = vmul.f32 0.00390625, %v102_v41 }
  0xa4   :  { %v789_v35 = vmul.f32 0.00390625, %v81_v31  ;;  %153 = vperm.xlu1 %665, %v134_v33   ;;  %150 = vperm.xlu0 %664, %v133_v34   ;;  %v792_v37 = vmul.f32 0.00390625, %v88_v32  ;;  %v109_v44 = vrot.slane %v50_v40, %v772_v22  ;;  %v116_v47 = vrot.slane %v50_v40, %v775_v23 }
  0xa5   :  { %v137_v43 = vmul.f32 %v796_v39, %v796_v39  ;;  %v138_v48 = vmul.f32 %v804_v45, %v804_v45 }
  0xa6   :  { %v135_v38 = vmul.f32 %v789_v35, %v789_v35  ;;  %v136_v42 = vmul.f32 %v792_v37, %v792_v37  ;;  %v806_v46 = vmul.f32 0.00390625, %v109_v44  ;;  %v813_v50 = vmul.f32 0.00390625, %v116_v47 }
  0xa7   :  { %v273_v47 = vsub.s32 3, %v769_v20 }
  0xa8   :  { %156 = vperm.xlu1 %665, %v135_v38   ;;  %v139_v49 = vmul.f32 %v806_v46, %v806_v46  ;;  %v140_v51 = vmul.f32 %v813_v50, %v813_v50  ;;  %350 = vbcast.lane.b32.xlu0 %v348_v18, 256 }
  0xac   :  { %159 = vperm.xlu1 %665, %v136_v42  }
  0xb0   :  { %162 = vperm.xlu1 %665, %v137_v43   ;;  %v266_v43 = vsub.s32 2, %v769_v20 }
  0xb4   :  { %165 = vperm.xlu1 %665, %v138_v48  }
  0xb8   :  { %168 = vperm.xlu1 %665, %v139_v49   ;;  %v280_v49 = vsub.s32 4, %v769_v20 }
  0xbc   :  { %171 = vperm.xlu1 %665, %v140_v51  }
 0x11f   :  { %v154_v52 = vpop.permute.xlu1 %153  ;;  %v151_v58 = vpop.permute.xlu0 %150 }
 0x120   :  { %v182_v60 = vrot.slane %v154_v52, %v818_v57  ;;  %v178_v61 = vrot.slane %v151_v58, %v818_v57  ;;  %v287_v52 = vsub.s32 5, %v769_v20  ;;  %v362_v58 = vrot.slane %v344_v17, %v266_v43 }
 0x122   :  { %v208_v2 = vsel %vm207_vm0, %v182_v60, %v178_v61  ;;  %v376_v60 = vrot.slane %v344_v17, %v280_v49  ;;  %v383_v61 = vrot.slane %v344_v17, %v287_v52 }
 0x123   :  { %v157_v53 = vpop.permute.xlu1 %156 }
 0x124   :  { %v186_v62 = vrot.slane %v157_v53, %v818_v57 }
 0x126   :  { %v210_v4 = vsel %vm209_vm1, %v186_v62, %v208_v2  ;;  %v397_v62 = vrot.slane %v344_v17, %v301_v55 }
 0x127   :  { %v160_v54 = vpop.permute.xlu1 %159 }
 0x128   :  { %v190_v63 = vrot.slane %v160_v54, %v818_v57 }
 0x12a   :  { %v212_v6 = vsel %vm211_vm2, %v190_v63, %v210_v4  ;;  %v351_v63 = vpop.permute.xlu0 %350 }
 0x12b   :  { %v163_v56 = vpop.permute.xlu1 %162 }
 0x12c   :  { %v194_v0 = vrot.slane %v163_v56, %v818_v57 }
 0x12e   :  { %v214_v7 = vsel %vm213_vm3, %v194_v0, %v212_v6 }
 0x12f   :  { %v166_v59 = vpop.permute.xlu1 %165 }
 0x130   :  { %v198_v3 = vrot.slane %v166_v59, %v818_v57  ;;  %v369_v59 = vrot.slane %v344_v17, %v273_v47 }
 0x132   :  { %v216_v9 = vsel %vm215_vm4, %v198_v3, %v214_v7 }
 0x133   :  { %v169_v1 = vpop.permute.xlu1 %168 }
 0x134   :  { %v202_v5 = vrot.slane %v169_v1, %v818_v57 }
 0x136   :  { %v218_v11 = vsel %vm217_vm5, %v202_v5, %v216_v9 }
 0x137   :  { %v172_v8 = vpop.permute.xlu1 %171 }
 0x138   :  { %v206_v10 = vrot.slane %v172_v8, %v818_v57 }
 0x13a   :  { %v220_v12 = vsel %vm219_vm6, %v206_v10, %v218_v11 }
 0x13b   :  { %v223_v13 = vsel %vm222_vm7, %v220_v12, 0.0 }
 0x13c   :  { %224 = vadd.xlane.f32.xlu1 %v223_v13 }
 0x14d   :  { %357 = vbcast.lane.b32.xlu1 %v355_v21, 256 }
 0x151   :  { %392 = vbcast.lane.b32.xlu1 %v390_v25, 256 }
 0x1c5   :  { %v225_v26 = vpop.xlane.xlu1 %224 }
 0x1c6   :  { %666 = vrsqrt.f32 %v225_v26  ;;  %vm228_vm8 = vcmp.eq.f32.partialorder %v225_v26, inf  ;;  %v231_v31 = vand.u32 2147483648, %v225_v26  ;;  %vm230_vm9 = vcmp.eq.f32.partialorder %v225_v26, 0.0 }
 0x1c9   :  { %v358_v11 = vpop.permute.xlu1 %357 }
 0x1d3   :  { %v667_v29 = vpop.eup %666 }
 0x1d4   :  { %v227_v30 = vmul.f32 %v667_v29, %v225_v26 }
 0x1d6   :  { %v229_v32 = vsel %vm228_vm8, %v225_v26, %v227_v30 }
 0x1d7   :  { %v232_v33 = vsel %vm230_vm9, %v231_v31, %v229_v32 }
 0x1d8   :  { %v233_v34 = vmax.f32 %v232_v33, 1e-12 }
 0x1da   :  { %v241_v36 = vrot.slane %v233_v34, %v772_v22  ;;  %v248_v38 = vrot.slane %v233_v34, %v775_v23 }
 0x1dc   :  { %v249_v40 = vcombine.low %v241_v36, %v248_v38 }
 0x1de   :  { %v253_v41 = vrot.slane %v249_v40, %v840_v16  ;;  %v260_v42 = vrot.slane %v249_v40, %v844_v19  ;;  %v267_v44 = vrot.slane %v249_v40, %v266_v43  ;;  %v274_v48 = vrot.slane %v249_v40, %v273_v47  ;;  %v393_v43 = vpop.permute.xlu1 %392 }
 0x1df   :  { %v281_v51 = vrot.slane %v249_v40, %v280_v49  ;;  %v288_v53 = vrot.slane %v249_v40, %v287_v52  ;;  %v295_v54 = vrot.slane %v249_v40, %v294_v24  ;;  %v302_v56 = vrot.slane %v249_v40, %v301_v55 }
 0x1e0   :  { %255 = vbcast.lane.b32.xlu0 %v253_v41, 256 }
 0x1e4   :  { %262 = vbcast.lane.b32.xlu0 %v260_v42, 256 }
 0x1e8   :  { %269 = vbcast.lane.b32.xlu0 %v267_v44, 256 }
 0x1ec   :  { %276 = vbcast.lane.b32.xlu0 %v274_v48, 256 }
 0x1f0   :  { %283 = vbcast.lane.b32.xlu0 %v281_v51, 256 }
 0x1f4   :  { %290 = vbcast.lane.b32.xlu0 %v288_v53, 256 }
 0x1f8   :  { %297 = vbcast.lane.b32.xlu0 %v295_v54, 256 }
 0x1fc   :  { %304 = vbcast.lane.b32.xlu0 %v302_v56, 256 }
 0x200   :  { %364 = vbcast.lane.b32.xlu0 %v362_v58, 256 }
 0x204   :  { %371 = vbcast.lane.b32.xlu0 %v369_v59, 256 }
 0x208   :  { %378 = vbcast.lane.b32.xlu0 %v376_v60, 256 }
 0x20c   :  { %385 = vbcast.lane.b32.xlu0 %v383_v61, 256 }
 0x210   :  { %399 = vbcast.lane.b32.xlu0 %v397_v62, 256 }
 0x252   :  { %v256_v0 = vpop.permute.xlu0 %255 }
 0x253   :  { %668 = vrcp.f32 %v256_v0 }
 0x256   :  { %v263_v1 = vpop.permute.xlu0 %262 }
 0x257   :  { %670 = vrcp.f32 %v263_v1 }
 0x25a   :  { %v270_v2 = vpop.permute.xlu0 %269 }
 0x25b   :  { %672 = vrcp.f32 %v270_v2 }
 0x25e   :  { %v277_v20 = vpop.permute.xlu0 %276 }
 0x25f   :  { %674 = vrcp.f32 %v277_v20 }
 0x260   :  { %v669_v3 = vpop.eup %668 }
 0x261   :  { %v315_v4 = vmul.f32 %v669_v3, %v779_v27 }
 0x262   :  { %v284_v5 = vpop.permute.xlu0 %283 }
 0x263   :  { %v330_v6 = vsub.f32 1.0, %v315_v4  ;;  %676 = vrcp.f32 %v284_v5 }
 0x264   :  { %v671_v7 = vpop.eup %670 }
 0x265   :  { %v409_v8 = vmul.f32 %v351_v63, %v330_v6  ;;  %v317_v9 = vmul.f32 %v671_v7, %v781_v28 }
 0x266   :  { %v291_v10 = vpop.permute.xlu0 %290 }
 0x267   :  { %426 = vperm.xlu1 %665, %v409_v8   ;;  %v331_v12 = vsub.f32 1.0, %v317_v9  ;;  %678 = vrcp.f32 %v291_v10 }
 0x268   :  { %v673_v14 = vpop.eup %672 }
 0x269   :  { %v410_v13 = vmul.f32 %v358_v11, %v331_v12  ;;  %v319_v17 = vmul.f32 %v673_v14, %v789_v35 }
 0x26a   :  { %v298_v15 = vpop.permute.xlu0 %297 }
 0x26b   :  { %680 = vrcp.f32 %v298_v15  ;;  %429 = vperm.xlu0 %664, %v410_v13   ;;  %v332_v21 = vsub.f32 1.0, %v319_v17 }
 0x26c   :  { %v675_v27 = vpop.eup %674 }
 0x26d   :  { %v321_v24 = vmul.f32 %v675_v27, %v792_v37 }
 0x26e   :  { %v305_v18 = vpop.permute.xlu0 %304 }
 0x26f   :  { %682 = vrcp.f32 %v305_v18  ;;  %v333_v29 = vsub.f32 1.0, %v321_v24 }
 0x270   :  { %v677_v25 = vpop.eup %676 }
 0x271   :  { %v323_v30 = vmul.f32 %v677_v25, %v796_v39 }
 0x272   :  { %v365_v28 = vpop.permute.xlu0 %364 }
 0x273   :  { %v411_v26 = vmul.f32 %v365_v28, %v332_v21  ;;  %v334_v36 = vsub.f32 1.0, %v323_v30 }
 0x274   :  { %v679_v31 = vpop.eup %678 }
 0x275   :  { %432 = vperm.xlu1 %665, %v411_v26   ;;  %v325_v38 = vmul.f32 %v679_v31, %v804_v45 }
 0x276   :  { %v372_v32 = vpop.permute.xlu0 %371 }
 0x277   :  { %v412_v33 = vmul.f32 %v372_v32, %v333_v29  ;;  %v335_v44 = vsub.f32 1.0, %v325_v38 }
 0x278   :  { %v681_v34 = vpop.eup %680 }
 0x279   :  { %435 = vperm.xlu0 %664, %v412_v33   ;;  %v327_v35 = vmul.f32 %v681_v34, %v806_v46  ;;  %v656_v46 = vld [vmem:[#allocation3] ss:$0 sm:$0xff] }
 0x27a   :  { %v379_v40 = vpop.permute.xlu0 %378 }
 0x27b   :  { %v413_v41 = vmul.f32 %v379_v40, %v334_v36  ;;  %v336_v37 = vsub.f32 1.0, %v327_v35 }
 0x27c   :  { %v683_v42 = vpop.eup %682 }
 0x27d   :  { %438 = vperm.xlu1 %665, %v413_v41   ;;  %v329_v47 = vmul.f32 %v683_v42, %v813_v50  ;;  %v415_v48 = vmul.f32 %v393_v43, %v336_v37 }
 0x27e   :  { %v386_v39 = vpop.permute.xlu0 %385 }
 0x27f   :  { %v414_v49 = vmul.f32 %v386_v39, %v335_v44  ;;  %v337_v51 = vsub.f32 1.0, %v329_v47 }
 0x281   :  { %444 = vperm.xlu1 %665, %v415_v48   ;;  %441 = vperm.xlu0 %664, %v414_v49  }
 0x282   :  { %v400_v52 = vpop.permute.xlu0 %399 }
 0x283   :  { %v416_v53 = vmul.f32 %v400_v52, %v337_v51 }
 0x285   :  { %447 = vperm.xlu0 %664, %v416_v53  }
 0x289   :  { %515 = vperm.xlu0 %664, %v656_v46  }
 0x2e2   :  { %v427_v45 = vpop.permute.xlu1 %426 }
 0x2e3   :  { %v452_v60 = vrot.slane %v427_v45, %v818_v57 }
 0x2e6   :  { %v430_v54 = vpop.permute.xlu0 %429 }
 0x2e7   :  { %v456_v58 = vrot.slane %v430_v54, %v818_v57 }
 0x2e9   :  { %v481_v63 = vsel %vm207_vm0, %v456_v58, %v452_v60 }
 0x2f0   :  { %v433_v55 = vpop.permute.xlu1 %432 }
 0x2f1   :  { %v460_v59 = vrot.slane %v433_v55, %v818_v57 }
 0x2f3   :  { %v482_v0 = vsel %vm209_vm1, %v460_v59, %v481_v63 }
 0x2f4   :  { %v436_v56 = vpop.permute.xlu0 %435 }
 0x2f5   :  { %v464_v61 = vrot.slane %v436_v56, %v818_v57 }
 0x2f7   :  { %v483_v20 = vsel %vm211_vm2, %v464_v61, %v482_v0 }
 0x2f8   :  { %v439_v50 = vpop.permute.xlu1 %438 }
 0x2f9   :  { %v468_v62 = vrot.slane %v439_v50, %v818_v57 }
 0x2fb   :  { %v484_v4 = vsel %vm213_vm3, %v468_v62, %v483_v20 }
 0x2fc   :  { %v445_v1 = vpop.permute.xlu1 %444  ;;  %v442_v2 = vpop.permute.xlu0 %441 }
 0x2fd   :  { %v472_v3 = vrot.slane %v442_v2, %v818_v57  ;;  %v476_v5 = vrot.slane %v445_v1, %v818_v57 }
 0x2ff   :  { %v485_v6 = vsel %vm215_vm4, %v472_v3, %v484_v4 }
 0x300   :  { %v448_v7 = vpop.permute.xlu0 %447  ;;  %v486_v9 = vsel %vm217_vm5, %v476_v5, %v485_v6 }
 0x301   :  { %v480_v8 = vrot.slane %v448_v7, %v818_v57 }
 0x303   :  { %v487_v10 = vsel %vm219_vm6, %v480_v8, %v486_v9 }
 0x304   :  { %v489_v11 = vsel %vm222_vm7, %v487_v10, 0.0  ;;  %v516_v14 = vpop.permute.xlu0 %515 }
 0x305   :  { %490 = vadd.xlane.f32.xlu1 %v489_v11 }
 0x38e   :  { %v491_v12 = vpop.xlane.xlu1 %490 }
 0x38f   :  { %v499_v13 = vrot.slane %v491_v12, %v772_v22  ;;  %v506_v15 = vrot.slane %v491_v12, %v775_v23 }
 0x391   :  { %v518_v17 = vadd.f32 %v516_v14, %v499_v13  ;;  %v519_v27 = vadd.f32 %v516_v14, %v506_v15 }
 0x393   :  { %523 = vperm.xlu0 %664, %v518_v17  }
 0x397   :  { %526 = vperm.xlu0 %664, %v519_v27  }
 0x40e   :  { %v524_v18 = vpop.permute.xlu0 %523 }
 0x40f   :  { %v531_v24 = vrot.slane %v524_v18, %v818_v57 }
 0x412   :  { %v527_v21 = vpop.permute.xlu0 %526 }
 0x413   :  { %v535_v25 = vrot.slane %v527_v21, %v818_v57 }
 0x415   :  { %v536_v28 = vsel %vm207_vm0, %v535_v25, %v531_v24 }
 0x416   :  { %v539_v26 = vsel %vm538_vm10, %v536_v28, -inf }
 0x417   :  { %540 = vmax.xlane.f32.xlu0 %v539_v26 }
 0x4a0   :  { %v541_v29 = vpop.xlane.xlu0 %540 }
 0x4a1   :  { %v549_v30 = vrot.slane %v541_v29, %v772_v22 }
 0x4a3   :  { %v560_v23 = vrot.slane %v549_v30, %v844_v19  ;;  %v553_v31 = vrot.slane %v549_v30, %v840_v16 }
 0x4a5   :  { %562 = vbcast.lane.b32.xlu0 %v560_v23, 256  ;;  %555 = vbcast.lane.b32.xlu1 %v553_v31, 256 }
 0x517   :  { %v563_v32 = vpop.permute.xlu0 %562  ;;  %v556_v33 = vpop.permute.xlu1 %555 }
 0x518   :  { %v566_v34 = vsub.f32 %v518_v17, %v556_v33  ;;  %v567_v36 = vsub.f32 %v519_v27, %v563_v32 }
 0x51a   :  { %v568_v35 = vmul.f32 1.442695, %v566_v34  ;;  %v570_v38 = vmul.f32 1.442695, %v567_v36 }
 0x51c   :  { %684 = vpow2.f32 %v568_v35 }
 0x51d   :  { %686 = vpow2.f32 %v570_v38 }
 0x529   :  { %v685_v40 = vpop.eup %684 }
 0x52a   :  { %575 = vperm.xlu1 %665, %v685_v40   ;;  %v687_v41 = vpop.eup %686 }
 0x52e   :  { %578 = vperm.xlu1 %665, %v687_v41  }
 0x5a5   :  { %v576_v37 = vpop.permute.xlu1 %575 }
 0x5a6   :  { %v583_v43 = vrot.slane %v576_v37, %v818_v57 }
 0x5a9   :  { %v579_v42 = vpop.permute.xlu1 %578 }
 0x5aa   :  { %v587_v44 = vrot.slane %v579_v42, %v818_v57 }
 0x5ac   :  { %v588_v47 = vsel %vm207_vm0, %v587_v44, %v583_v43 }
 0x5ad   :  { %v590_v39 = vsel %vm538_vm10, %v588_v47, 0.0 }
 0x5ae   :  { %591 = vadd.xlane.f32.xlu1 %v590_v39 }
 0x637   :  { %v592_v48 = vpop.xlane.xlu1 %591 }
 0x638   :  { %v600_v49 = vrot.slane %v592_v48, %v772_v22 }
 0x63a   :  { %v604_v51 = vrot.slane %v600_v49, %v840_v16  ;;  %v611_v52 = vrot.slane %v600_v49, %v844_v19 }
 0x63c   :  { %606 = vbcast.lane.b32.xlu0 %v604_v51, 256 }
 0x640   :  { %613 = vbcast.lane.b32.xlu0 %v611_v52, 256 }
 0x6ae   :  { %v607_v53 = vpop.permute.xlu0 %606 }
 0x6af   :  { %688 = vrcp.f32 %v607_v53 }
 0x6b2   :  { %v614_v46 = vpop.permute.xlu0 %613 }
 0x6b3   :  { %690 = vrcp.f32 %v614_v46 }
 0x6bc   :  { %v689_v45 = vpop.eup %688 }
 0x6bd   :  { %v618_v54 = vmul.f32 %v689_v45, %v685_v40 }
 0x6bf   :  { %624 = vperm.xlu0 %664, %v618_v54  }
 0x6c0   :  { %v691_v55 = vpop.eup %690 }
 0x6c1   :  { %v620_v56 = vmul.f32 %v691_v55, %v687_v41 }
 0x6c3   :  { %627 = vperm.xlu0 %664, %v620_v56  }
 0x73a   :  { %v625_v58 = vpop.permute.xlu0 %624 }
 0x73b   :  { %v632_v16 = vrot.slane %v625_v58, %v818_v57 }
 0x73e   :  { %v628_v22 = vpop.permute.xlu0 %627 }
 0x73f   :  { %v636_v59 = vrot.slane %v628_v22, %v818_v57 }
 0x741   :  { %v637_v19 = vsel %vm207_vm0, %v636_v59, %v632_v16 }
 0x742   :  { %639 = vst.msk [vmem:[#allocation7] sm:$0x3] %vm538_vm10, %v637_v19 }
 0x743   :  { %723 = shalt.err (!%p720_p9)
}
 0x744   :  { %649 = dma.vmem_to_hbm [thread:$0]  %s647_s21, 32, %s907_s3, [#allocation6]  }
 0x745   :  { %734 = dma.done.wait [#allocation6], 32  }
 0x746   :  { %735 = vsyncadd [#allocation6], 4294967264 }
 0x747   :  { %653 = vsyncpa [#allocation5], 1 }
 0x748   :  { %654 = vsyncpa [#allocation6], 1 }

</bundles_post_ra>
